<compile_context>
chip_gen: v5e
topology: v5e:2x2
jax: 0.10.0
libtpu: 0.0.40
codegen_flags: <defaults>
</compile_context>

<pallas_src>
import jax
import jax.numpy as jnp
from jax.experimental import pallas as pl
from jax.experimental.pallas import tpu as pltpu

_LANE = 128


def _round_up(x, m):
    return (x + m - 1) // m * m


def _discriminator_kernel(xT_ref,
                          w1_ref, b1_ref,
                          w2_ref, b2_ref,
                          w3_ref, b3_ref,
                          w4_ref, b4_ref,
                          w5_ref, b5_ref,
                          o_ref):
    """One batch tile: 4 MXU matmuls + VPU ReLUs + VPU/XLU final layer + log-sigmoid."""

    def linear_relu(h, w_ref, b_ref):
        # (HID_P, K_P) @ (K_P, TB) -> (HID_P, TB), f32 accumulation on the MXU.
        y = jnp.dot(w_ref[...], h, preferred_element_type=jnp.float32)
        return jnp.maximum(y + b_ref[...], 0.0)

    h = xT_ref[...]                                        # (NZ_P, TB) bf16
    h = linear_relu(h, w1_ref, b1_ref).astype(jnp.bfloat16)
    h = linear_relu(h, w2_ref, b2_ref).astype(jnp.bfloat16)
    h = linear_relu(h, w3_ref, b3_ref).astype(jnp.bfloat16)
    h = linear_relu(h, w4_ref, b4_ref)                     # keep f32 for the reduction

    # Final Linear(hid -> 1): VPU multiply + cross-sublane (XLU) reduce instead
    # of an N=1 MXU pass.  Result is (1, TB): batch on lanes.
    z = jnp.sum(w5_ref[...] * h, axis=0, keepdims=True) + b5_ref[0, 0]

    # Numerically-stable LogSigmoid: log(sigmoid(z)) = min(z,0) - log1p(exp(-|z|)).
    ls = jnp.minimum(z, 0.0) - jnp.log1p(jnp.exp(-jnp.abs(z)))

    # Lane-dense, unmasked stores: replicate across the 8 sublanes of the out tile.
    o_ref[...] = jnp.broadcast_to(ls, o_ref.shape)


def init_discriminator_params(key, dim_h, n_z):
    """PyTorch-layout params: list of (w: (out, in), b: (out,)) for the 5 Linears."""
    hid = dim_h * 4
    dims = [(hid, n_z), (hid, hid), (hid, hid), (hid, hid), (1, hid)]
    params = []
    for (fan_out, fan_in) in dims:
        key, kw, kb = jax.random.split(key, 3)
        bound = 1.0 / jnp.sqrt(fan_in)        # PyTorch default Linear init range
        w = jax.random.uniform(kw, (fan_out, fan_in), jnp.float32, -bound, bound)
        b = jax.random.uniform(kb, (fan_out,), jnp.float32, -bound, bound)
        params.append((w, b))
    return params


def prepare_kernel_params(params):
    """Pad to (8,128)-aligned shapes; cast the 4 big MXU weights to bf16."""
    (w1, b1), (w2, b2), (w3, b3), (w4, b4), (w5, b5) = params
    hid, n_z = w1.shape
    HID_P = _round_up(hid, _LANE)
    NZ_P = _round_up(n_z, _LANE)

    def pad_w(w, rows, cols):
        return jnp.zeros((rows, cols), jnp.float32).at[:w.shape[0], :w.shape[1]].set(w)

    def pad_col(v, rows):
        return jnp.zeros((rows, 1), jnp.float32).at[:v.shape[0], 0].set(v)

    return (
        pad_w(w1, HID_P, NZ_P).astype(jnp.bfloat16), pad_col(b1, HID_P),
        pad_w(w2, HID_P, HID_P).astype(jnp.bfloat16), pad_col(b2, HID_P),
        pad_w(w3, HID_P, HID_P).astype(jnp.bfloat16), pad_col(b3, HID_P),
        pad_w(w4, HID_P, HID_P).astype(jnp.bfloat16), pad_col(b4, HID_P),
        pad_col(w5[0], HID_P),                  # last-layer weight column, f32 (VPU path)
        b5.reshape(1, 1).astype(jnp.float32),   # scalar bias -> SMEM
    )


def discriminator_forward(x, kernel_params, *, block_b=512):
    """x: (B, n_z) float array. kernel_params: output of prepare_kernel_params."""
    (w1, b1, w2, b2, w3, b3, w4, b4, w5c, b5s) = kernel_params
    B, n_z = x.shape
    HID_P, NZ_P = w1.shape

    # Batch tiling: pad B to a lane-aligned multiple of the block size.
    B_pad = _round_up(B, _LANE)
    TB = min(B_pad, block_b)
    B_pad = _round_up(B_pad, TB)
    num_blocks = B_pad // TB

    # Feature-major, zero-padded, bf16 input: (NZ_P, B_pad).
    xT = jnp.zeros((NZ_P, B_pad), jnp.bfloat16)
    xT = xT.at[:n_z, :B].set(x.astype(jnp.bfloat16).T)

    def resident(shape):
        return pl.BlockSpec(shape, lambda i: (0, 0))     # VMEM-resident across grid

    in_specs = [
        pl.BlockSpec((NZ_P, TB), lambda i: (0, i)),      # x^T: tiled over batch
        resident((HID_P, NZ_P)), resident((HID_P, 1)),   # w1, b1
        resident((HID_P, HID_P)), resident((HID_P, 1)),  # w2, b2
        resident((HID_P, HID_P)), resident((HID_P, 1)),  # w3, b3
        resident((HID_P, HID_P)), resident((HID_P, 1)),  # w4, b4
        resident((HID_P, 1)),                            # w5 column vector
        pl.BlockSpec(memory_space=pltpu.MemorySpace.SMEM),  # b5 scalar
    ]

    flops = 2 * B_pad * (HID_P * NZ_P + 3 * HID_P * HID_P + HID_P)
    weight_bytes = (HID_P * NZ_P + 3 * HID_P * HID_P) * 2 + (5 * HID_P + 1) * 4
    bytes_accessed = NZ_P * B_pad * 2 + 8 * B_pad * 4 + weight_bytes

    out = pl.pallas_call(
        _discriminator_kernel,
        grid=(num_blocks,),
        in_specs=in_specs,
        out_specs=pl.BlockSpec((8, TB), lambda i: (0, i)),
        out_shape=jax.ShapeDtypeStruct((8, B_pad), jnp.float32),
        compiler_params=pltpu.CompilerParams(
            dimension_semantics=("parallel",),   # shard batch tiles across TCs (v7x)
            vmem_limit_bytes=32 * 1024 * 1024,
        ),
        cost_estimate=pl.CostEstimate(
            flops=int(flops),
            transcendentals=int(2 * B_pad),
            bytes_accessed=int(bytes_accessed),
        ),
    )(xT, w1, b1, w2, b2, w3, b3, w4, b4, w5c, b5s)

    return out[0, :B].reshape(B, 1)


def _reference_forward(x, params):
    """Pure-JAX f32 reference matching the PyTorch module."""
    h = x
    for (w, b) in params[:-1]:
        h = jax.nn.relu(h @ w.T + b)
    w5, b5 = params[-1]
    return jax.nn.log_sigmoid(h @ w5.T + b5)


if __name__ == "__main__":
    dim_h = 8           # hidden = dim_h * 4 = 32
    n_z = 8
    batch = 8

    key = jax.random.PRNGKey(0)
    key, kx = jax.random.split(key)
    x = jax.random.normal(kx, (batch, n_z), dtype=jnp.float32)

    params = init_discriminator_params(key, dim_h, n_z)
    kparams = prepare_kernel_params(params)

    out = discriminator_forward(x, kparams)
    out = jax.block_until_ready(out)

    ref = _reference_forward(x, params)
    assert out.shape == (batch, 1)
    # bf16 MXU inputs -> compare against the f32 reference with a loose tolerance.
    assert jnp.allclose(out, ref, atol=5e-2, rtol=5e-2), "mismatch vs pure-JAX reference"

    print("KERNEL_OK")
</pallas_src>

<mosaic_0001>
module attributes {stable_mosaic.version = 11 : i64} {
  func.func @_discriminator_kernel(%arg0: i32, %arg1: memref<128x128xbf16, #tpu.memory_space<vmem>>, %arg2: memref<128x128xbf16, #tpu.memory_space<vmem>>, %arg3: memref<128x1xf32, #tpu.memory_space<vmem>>, %arg4: memref<128x128xbf16, #tpu.memory_space<vmem>>, %arg5: memref<128x1xf32, #tpu.memory_space<vmem>>, %arg6: memref<128x128xbf16, #tpu.memory_space<vmem>>, %arg7: memref<128x1xf32, #tpu.memory_space<vmem>>, %arg8: memref<128x128xbf16, #tpu.memory_space<vmem>>, %arg9: memref<128x1xf32, #tpu.memory_space<vmem>>, %arg10: memref<128x1xf32, #tpu.memory_space<vmem>>, %arg11: memref<1x1xf32, #tpu.memory_space<smem>>, %arg12: memref<8x128xf32, #tpu.memory_space<vmem>>) attributes {dimension_semantics = [#tpu.dimension_semantics<parallel>], iteration_bounds = array<i64: 1>, scalar_prefetch = 0 : i64, scratch_operands = 0 : i64, tpu.core_type = #tpu.core_type<tc>, window_params = [{transform_indices = @transform_0, window_bounds = array<i64: 128, 128>}, {pipeline_mode = #tpu.pipeline_mode<synchronous>, transform_indices = @transform_1, window_bounds = array<i64: 128, 128>}, {pipeline_mode = #tpu.pipeline_mode<synchronous>, transform_indices = @transform_2, window_bounds = array<i64: 128, 1>}, {pipeline_mode = #tpu.pipeline_mode<synchronous>, transform_indices = @transform_3, window_bounds = array<i64: 128, 128>}, {pipeline_mode = #tpu.pipeline_mode<synchronous>, transform_indices = @transform_4, window_bounds = array<i64: 128, 1>}, {pipeline_mode = #tpu.pipeline_mode<synchronous>, transform_indices = @transform_5, window_bounds = array<i64: 128, 128>}, {pipeline_mode = #tpu.pipeline_mode<synchronous>, transform_indices = @transform_6, window_bounds = array<i64: 128, 1>}, {pipeline_mode = #tpu.pipeline_mode<synchronous>, transform_indices = @transform_7, window_bounds = array<i64: 128, 128>}, {pipeline_mode = #tpu.pipeline_mode<synchronous>, transform_indices = @transform_8, window_bounds = array<i64: 128, 1>}, {pipeline_mode = #tpu.pipeline_mode<synchronous>, transform_indices = @transform_9, window_bounds = array<i64: 128, 1>}, {transform_indices = @transform_10, window_bounds = array<i64: 1, 1>}, {transform_indices = @transform_11, window_bounds = array<i64: 8, 128>}]} {
    %c0 = arith.constant 0 : index
    %c0_0 = arith.constant 0 : index
    %0 = vector.load %arg1[%c0, %c0_0] : memref<128x128xbf16, #tpu.memory_space<vmem>>, vector<128x128xbf16>
    %c0_1 = arith.constant 0 : index
    %c0_2 = arith.constant 0 : index
    %1 = vector.load %arg2[%c0_1, %c0_2] : memref<128x128xbf16, #tpu.memory_space<vmem>>, vector<128x128xbf16>
    %cst = arith.constant dense<0.000000e+00> : vector<128x128xf32>
    %2 = tpu.matmul %1, %0, %cst {dimension_numbers = #tpu.dot_dimension_numbers<[1], [0], [0], [1], [0, 0, 1, 1], [], []>} : vector<128x128xbf16>, vector<128x128xbf16>, vector<128x128xf32> -> vector<128x128xf32>
    %c0_3 = arith.constant 0 : index
    %c0_4 = arith.constant 0 : index
    %3 = vector.load %arg3[%c0_3, %c0_4] : memref<128x1xf32, #tpu.memory_space<vmem>>, vector<128x1xf32>
    %4 = vector.broadcast %3 : vector<128x1xf32> to vector<128x128xf32>
    %5 = arith.addf %2, %4 : vector<128x128xf32>
    %cst_5 = arith.constant 0.000000e+00 : f32
    %6 = vector.broadcast %cst_5 : f32 to vector<128x128xf32>
    %7 = arith.maximumf %5, %6 : vector<128x128xf32>
    %8 = arith.truncf %7 : vector<128x128xf32> to vector<128x128xbf16>
    %c0_6 = arith.constant 0 : index
    %c0_7 = arith.constant 0 : index
    %9 = vector.load %arg4[%c0_6, %c0_7] : memref<128x128xbf16, #tpu.memory_space<vmem>>, vector<128x128xbf16>
    %cst_8 = arith.constant dense<0.000000e+00> : vector<128x128xf32>
    %10 = tpu.matmul %9, %8, %cst_8 {dimension_numbers = #tpu.dot_dimension_numbers<[1], [0], [0], [1], [0, 0, 1, 1], [], []>} : vector<128x128xbf16>, vector<128x128xbf16>, vector<128x128xf32> -> vector<128x128xf32>
    %c0_9 = arith.constant 0 : index
    %c0_10 = arith.constant 0 : index
    %11 = vector.load %arg5[%c0_9, %c0_10] : memref<128x1xf32, #tpu.memory_space<vmem>>, vector<128x1xf32>
    %12 = vector.broadcast %11 : vector<128x1xf32> to vector<128x128xf32>
    %13 = arith.addf %10, %12 : vector<128x128xf32>
    %cst_11 = arith.constant 0.000000e+00 : f32
    %14 = vector.broadcast %cst_11 : f32 to vector<128x128xf32>
    %15 = arith.maximumf %13, %14 : vector<128x128xf32>
    %16 = arith.truncf %15 : vector<128x128xf32> to vector<128x128xbf16>
    %c0_12 = arith.constant 0 : index
    %c0_13 = arith.constant 0 : index
    %17 = vector.load %arg6[%c0_12, %c0_13] : memref<128x128xbf16, #tpu.memory_space<vmem>>, vector<128x128xbf16>
    %cst_14 = arith.constant dense<0.000000e+00> : vector<128x128xf32>
    %18 = tpu.matmul %17, %16, %cst_14 {dimension_numbers = #tpu.dot_dimension_numbers<[1], [0], [0], [1], [0, 0, 1, 1], [], []>} : vector<128x128xbf16>, vector<128x128xbf16>, vector<128x128xf32> -> vector<128x128xf32>
    %c0_15 = arith.constant 0 : index
    %c0_16 = arith.constant 0 : index
    %19 = vector.load %arg7[%c0_15, %c0_16] : memref<128x1xf32, #tpu.memory_space<vmem>>, vector<128x1xf32>
    %20 = vector.broadcast %19 : vector<128x1xf32> to vector<128x128xf32>
    %21 = arith.addf %18, %20 : vector<128x128xf32>
    %cst_17 = arith.constant 0.000000e+00 : f32
    %22 = vector.broadcast %cst_17 : f32 to vector<128x128xf32>
    %23 = arith.maximumf %21, %22 : vector<128x128xf32>
    %24 = arith.truncf %23 : vector<128x128xf32> to vector<128x128xbf16>
    %c0_18 = arith.constant 0 : index
    %c0_19 = arith.constant 0 : index
    %25 = vector.load %arg8[%c0_18, %c0_19] : memref<128x128xbf16, #tpu.memory_space<vmem>>, vector<128x128xbf16>
    %cst_20 = arith.constant dense<0.000000e+00> : vector<128x128xf32>
    %26 = tpu.matmul %25, %24, %cst_20 {dimension_numbers = #tpu.dot_dimension_numbers<[1], [0], [0], [1], [0, 0, 1, 1], [], []>} : vector<128x128xbf16>, vector<128x128xbf16>, vector<128x128xf32> -> vector<128x128xf32>
    %c0_21 = arith.constant 0 : index
    %c0_22 = arith.constant 0 : index
    %27 = vector.load %arg9[%c0_21, %c0_22] : memref<128x1xf32, #tpu.memory_space<vmem>>, vector<128x1xf32>
    %28 = vector.broadcast %27 : vector<128x1xf32> to vector<128x128xf32>
    %29 = arith.addf %26, %28 : vector<128x128xf32>
    %cst_23 = arith.constant 0.000000e+00 : f32
    %30 = vector.broadcast %cst_23 : f32 to vector<128x128xf32>
    %31 = arith.maximumf %29, %30 : vector<128x128xf32>
    %c0_24 = arith.constant 0 : index
    %c0_25 = arith.constant 0 : index
    %32 = vector.load %arg10[%c0_24, %c0_25] : memref<128x1xf32, #tpu.memory_space<vmem>>, vector<128x1xf32>
    %33 = vector.broadcast %32 : vector<128x1xf32> to vector<128x128xf32>
    %34 = arith.mulf %33, %31 : vector<128x128xf32>
    %cst_26 = arith.constant dense<0.000000e+00> : vector<128xf32>
    %35 = vector.multi_reduction <add>, %34, %cst_26 [0] : vector<128x128xf32> to vector<128xf32>
    %36 = vector.shape_cast %35 : vector<128xf32> to vector<1x128xf32>
    %c0_27 = arith.constant 0 : index
    %c0_28 = arith.constant 0 : index
    %37 = memref.load %arg11[%c0_27, %c0_28] : memref<1x1xf32, #tpu.memory_space<smem>>
    %38 = vector.broadcast %37 : f32 to vector<1x128xf32>
    %39 = arith.addf %36, %38 : vector<1x128xf32>
    %cst_29 = arith.constant 0.000000e+00 : f32
    %40 = vector.broadcast %cst_29 : f32 to vector<1x128xf32>
    %41 = arith.minimumf %39, %40 : vector<1x128xf32>
    %42 = math.absf %39 : vector<1x128xf32>
    %cst_30 = arith.constant 0.000000e+00 : f32
    %43 = vector.broadcast %cst_30 : f32 to vector<1x128xf32>
    %44 = arith.subf %43, %42 : vector<1x128xf32>
    %45 = math.exp %44 : vector<1x128xf32>
    %46 = math.log1p %45 : vector<1x128xf32>
    %47 = arith.subf %41, %46 : vector<1x128xf32>
    %48 = vector.shape_cast %47 : vector<1x128xf32> to vector<1x128xf32>
    %49 = vector.broadcast %48 : vector<1x128xf32> to vector<8x128xf32>
    %c0_31 = arith.constant 0 : index
    %c0_32 = arith.constant 0 : index
    %50 = vector.load %arg12[%c0_31, %c0_32] : memref<8x128xf32, #tpu.memory_space<vmem>>, vector<8x128xf32>
    tpu.vector_store %arg12[%c0_31, %c0_32], %49 {strides = array<i32>} : memref<8x128xf32, #tpu.memory_space<vmem>>, vector<8x128xf32>,
    return
  }
  func.func @transform_0(%arg0: i32) -> (i32, i32) {
    %c0_i32 = arith.constant 0 : i32
    %c0_i32_0 = arith.constant 0 : i32
    return %c0_i32, %arg0 : i32, i32
  }
  func.func @transform_1(%arg0: i32) -> (i32, i32) {
    %c0_i32 = arith.constant 0 : i32
    %c0_i32_0 = arith.constant 0 : i32
    %c0_i32_1 = arith.constant 0 : i32
    return %c0_i32, %c0_i32_0 : i32, i32
  }
  func.func @transform_2(%arg0: i32) -> (i32, i32) {
    %c0_i32 = arith.constant 0 : i32
    %c0_i32_0 = arith.constant 0 : i32
    %c0_i32_1 = arith.constant 0 : i32
    return %c0_i32, %c0_i32_0 : i32, i32
  }
  func.func @transform_3(%arg0: i32) -> (i32, i32) {
    %c0_i32 = arith.constant 0 : i32
    %c0_i32_0 = arith.constant 0 : i32
    %c0_i32_1 = arith.constant 0 : i32
    return %c0_i32, %c0_i32_0 : i32, i32
  }
  func.func @transform_4(%arg0: i32) -> (i32, i32) {
    %c0_i32 = arith.constant 0 : i32
    %c0_i32_0 = arith.constant 0 : i32
    %c0_i32_1 = arith.constant 0 : i32
    return %c0_i32, %c0_i32_0 : i32, i32
  }
  func.func @transform_5(%arg0: i32) -> (i32, i32) {
    %c0_i32 = arith.constant 0 : i32
    %c0_i32_0 = arith.constant 0 : i32
    %c0_i32_1 = arith.constant 0 : i32
    return %c0_i32, %c0_i32_0 : i32, i32
  }
  func.func @transform_6(%arg0: i32) -> (i32, i32) {
    %c0_i32 = arith.constant 0 : i32
    %c0_i32_0 = arith.constant 0 : i32
    %c0_i32_1 = arith.constant 0 : i32
    return %c0_i32, %c0_i32_0 : i32, i32
  }
  func.func @transform_7(%arg0: i32) -> (i32, i32) {
    %c0_i32 = arith.constant 0 : i32
    %c0_i32_0 = arith.constant 0 : i32
    %c0_i32_1 = arith.constant 0 : i32
    return %c0_i32, %c0_i32_0 : i32, i32
  }
  func.func @transform_8(%arg0: i32) -> (i32, i32) {
    %c0_i32 = arith.constant 0 : i32
    %c0_i32_0 = arith.constant 0 : i32
    %c0_i32_1 = arith.constant 0 : i32
    return %c0_i32, %c0_i32_0 : i32, i32
  }
  func.func @transform_9(%arg0: i32) -> (i32, i32) {
    %c0_i32 = arith.constant 0 : i32
    %c0_i32_0 = arith.constant 0 : i32
    %c0_i32_1 = arith.constant 0 : i32
    return %c0_i32, %c0_i32_0 : i32, i32
  }
  func.func @transform_10(%arg0: i32) -> (i32, i32) {
    %c0_i32 = arith.constant 0 : i32
    %c0_i32_0 = arith.constant 0 : i32
    %c0_i32_1 = arith.constant 0 : i32
    return %c0_i32, %c0_i32_0 : i32, i32
  }
  func.func @transform_11(%arg0: i32) -> (i32, i32) {
    %c0_i32 = arith.constant 0 : i32
    %c0_i32_0 = arith.constant 0 : i32
    return %c0_i32, %arg0 : i32, i32
  }
}

</mosaic_0001>

<bundles_post_ra>
// kernel: tpu_custom_call.1
= control target key start
LH: loop header
LB: loop body
LE: loop exit
PB: predicated region body
PF: predicated region fallthrough
CT: control target
= control target key end

     0   :  { %v1431_v3 = vmov 0   ;;  %s1907_s0 = inlined_call_operand.vmem [shape: bf16[128,128], index: 0, kind: input, shape index: {}]   ;;  %s1908_s1 = inlined_call_operand.vmem [shape: bf16[128,128], index: 1, kind: input, shape index: {}]   ;;  %s1909_s2 = inlined_call_operand.vmem [shape: f32[128,1], index: 2, kind: input, shape index: {}]   ;;  %s1910_s3 = inlined_call_operand.vmem [shape: bf16[128,128], index: 3, kind: input, shape index: {}]   ;;  %s1911_s4 = inlined_call_operand.vmem [shape: f32[128,1], index: 4, kind: input, shape index: {}]   ;;  %s1912_s5 = inlined_call_operand.vmem [shape: bf16[128,128], index: 5, kind: input, shape index: {}]   ;;  %s1913_s6 = inlined_call_operand.vmem [shape: f32[128,1], index: 6, kind: input, shape index: {}]   ;;  %s1914_s7 = inlined_call_operand.vmem [shape: bf16[128,128], index: 7, kind: input, shape index: {}]   ;;  %s1915_s8 = inlined_call_operand.vmem [shape: f32[128,1], index: 8, kind: input, shape index: {}]   ;;  %s1916_s9 = inlined_call_operand.vmem [shape: f32[128,1], index: 9, kind: input, shape index: {}]   ;;  %s1917_s10 = inlined_call_operand.<no memory space> [shape: f32[1,1], index: 10, kind: input, shape index: {}]   ;;  %s1918_s11 = inlined_call_operand.hbm [shape: f32[8,128], index: 11, kind: output, shape index: {}]  }
   0x1   :  { %v86_v0 = vld [vmem:[%s1909_s2 + $0x70] sm:$0xff]  ;;  %v84_v1 = vld [vmem:[%s1909_s2 + $0x60] sm:$0xff]  ;;  %1400 = vset.pattern.permute.xlu2 %v1431_v3  ;;  %1399 = vset.pattern.permute.xlu1 %v1431_v3  ;;  %v1363_v4 = vld [vmem:[%s1907_s0 + $0x38] sm:$0xff] }
   0x2   :  { %v82_v2 = vld [vmem:[%s1909_s2 + $0x50] sm:$0xff]  ;;  %1398 = vset.pattern.permute.xlu0 %v1431_v3  ;;  %150 = vperm.xlu1 %1399, %v84_v1   ;;  %v87_v6 = vld [vmem:[%s1909_s2 + $0x78] sm:$0xff]  ;;  %v85_v7 = vld [vmem:[%s1909_s2 + $0x68] sm:$0xff] }
   0x3   :  { %160 = vperm.xlu0 %1398, %v86_v0   ;;  %140 = vperm.xlu2 %1400, %v82_v2   ;;  %v1362_v5 = vld [vmem:[%s1907_s0 + $0x30] sm:$0xff]  ;;  %v83_v8 = vld [vmem:[%s1909_s2 + $0x58] sm:$0xff]  ;;  %v1361_v9 = vld [vmem:[%s1907_s0 + $0x28] sm:$0xff] }
   0x4   :  { %264 = vmatpush.bf16.msra.mxu0 %v1363_v4 }
   0x8   :  { %265 = vmatpush.bf16.msra.mxu0 %v1362_v5 }
   0x9   :  { %17 = vsyncpa [#allocation4], 0  ;;  %v1360_v10 = vld [vmem:[%s1907_s0 + $0x20] sm:$0xff]  ;;  %v81_v11 = vld [vmem:[%s1909_s2 + $0x48] sm:$0xff]  ;;  %s1432_s29 = smov [#allocation3]  }
   0xa   :  { %155 = vperm.xlu1 %1399, %v85_v7   ;;  %v80_v12 = vld [vmem:[%s1909_s2 + $0x40] sm:$0xff]  ;;  %v78_v13 = vld [vmem:[%s1909_s2 + $0x30] sm:$0xff]  ;;  %v1359_v14 = vld [vmem:[%s1907_s0 + $0x18] sm:$0xff] }
   0xb   :  { %165 = vperm.xlu0 %1398, %v87_v6   ;;  %145 = vperm.xlu2 %1400, %v83_v8   ;;  %v1358_v15 = vld [vmem:[%s1907_s0 + $0x10] sm:$0xff]  ;;  %v76_v16 = vld [vmem:[%s1909_s2 + $0x20] sm:$0xff]  ;;  %v79_v17 = vld [vmem:[%s1909_s2 + $0x38] sm:$0xff] }
   0xc   :  { %266 = vmatpush.bf16.msra.mxu0 %v1361_v9  ;;  %v77_v18 = vld [vmem:[%s1909_s2 + $0x28] sm:$0xff]  ;;  %v1356_v20 = vld [vmem:[%s1907_s0] sm:$0xff]  ;;  %v75_v21 = vld [vmem:[%s1909_s2 + $0x18] sm:$0xff] }
   0xd   :  { %v1357_v19 = vld [vmem:[%s1907_s0 + $0x8] sm:$0xff]  ;;  %v74_v22 = vld [vmem:[%s1909_s2 + $0x10] sm:$0xff]  ;;  %v72_v23 = vld [vmem:[%s1909_s2] sm:$0xff] }
   0xe   :  { %v1364_v24 = vld [vmem:[%s1908_s1] sm:$0xff]  ;;  %v367_v25 = vld [vmem:[%s1911_s4 + $0x70] sm:$0xff]  ;;  %v73_v26 = vld [vmem:[%s1909_s2 + $0x8] sm:$0xff] }
   0xf   :  { %v368_v27 = vld [vmem:[%s1911_s4 + $0x78] sm:$0xff]  ;;  %v366_v28 = vld [vmem:[%s1911_s4 + $0x68] sm:$0xff]  ;;  %v365_v29 = vld [vmem:[%s1911_s4 + $0x60] sm:$0xff] }
  0x10   :  { %267 = vmatpush.bf16.msra.mxu0 %v1360_v10  ;;  %v363_v30 = vld [vmem:[%s1911_s4 + $0x50] sm:$0xff]  ;;  %v1365_v31 = vld [vmem:[%s1908_s1 + $0x8] sm:$0xff]  ;;  %v361_v32 = vld [vmem:[%s1911_s4 + $0x40] sm:$0xff] }
  0x11   :  { %v364_v33 = vld [vmem:[%s1911_s4 + $0x58] sm:$0xff]  ;;  %v362_v34 = vld [vmem:[%s1911_s4 + $0x48] sm:$0xff]  ;;  %v359_v36 = vld [vmem:[%s1911_s4 + $0x30] sm:$0xff] }
  0x12   :  { %135 = vperm.xlu1 %1399, %v81_v11   ;;  %v360_v35 = vld [vmem:[%s1911_s4 + $0x38] sm:$0xff]  ;;  %v357_v37 = vld [vmem:[%s1911_s4 + $0x20] sm:$0xff]  ;;  %v1366_v38 = vld [vmem:[%s1908_s1 + $0x10] sm:$0xff] }
  0x13   :  { %130 = vperm.xlu0 %1398, %v80_v12   ;;  %120 = vperm.xlu2 %1400, %v78_v13   ;;  %v355_v39 = vld [vmem:[%s1911_s4 + $0x10] sm:$0xff]  ;;  %v358_v40 = vld [vmem:[%s1911_s4 + $0x28] sm:$0xff]  ;;  %v356_v41 = vld [vmem:[%s1911_s4 + $0x18] sm:$0xff] }
  0x14   :  { %268 = vmatpush.bf16.msra.mxu0 %v1359_v14  ;;  %v354_v42 = vld [vmem:[%s1911_s4 + $0x8] sm:$0xff]  ;;  %v353_v43 = vld [vmem:[%s1911_s4] sm:$0xff]  ;;  %v600_v44 = vld [vmem:[%s1913_s6 + $0x70] sm:$0xff]  ;;  %s1185_s4 = sshll.u32 %s1432_s29, 4  ;;  %s1186_s4 = int_to_ptr.vmem [resolvable:$true] %s1185_s4 }
  0x15   :  { %v1367_v45 = vld [vmem:[%s1908_s1 + $0x18] sm:$0xff]  ;;  %v598_v46 = vld [vmem:[%s1913_s6 + $0x60] sm:$0xff]  ;;  %v599_v48 = vld [vmem:[%s1913_s6 + $0x68] sm:$0xff] }
  0x16   :  { %v601_v47 = vld [vmem:[%s1913_s6 + $0x78] sm:$0xff]  ;;  %v596_v50 = vld [vmem:[%s1913_s6 + $0x50] sm:$0xff]  ;;  %v594_v51 = vld [vmem:[%s1913_s6 + $0x40] sm:$0xff] }
  0x17   :  { %v597_v49 = vld [vmem:[%s1913_s6 + $0x58] sm:$0xff]  ;;  %v1368_v52 = vld [vmem:[%s1908_s1 + $0x20] sm:$0xff]  ;;  %v592_v53 = vld [vmem:[%s1913_s6 + $0x30] sm:$0xff] }
  0x18   :  { %269 = vmatpush.bf16.msra.mxu0 %v1358_v15  ;;  %v595_v54 = vld [vmem:[%s1913_s6 + $0x48] sm:$0xff]  ;;  %v593_v55 = vld [vmem:[%s1913_s6 + $0x38] sm:$0xff]  ;;  %v590_v57 = vld [vmem:[%s1913_s6 + $0x20] sm:$0xff] }
  0x19   :  { %v591_v56 = vld [vmem:[%s1913_s6 + $0x28] sm:$0xff]  ;;  %v588_v58 = vld [vmem:[%s1913_s6 + $0x10] sm:$0xff]  ;;  %v586_v61 = vld [vmem:[%s1913_s6] sm:$0xff] }
  0x1a   :  { %110 = vperm.xlu1 %1399, %v76_v16   ;;  %v1369_v59 = vld [vmem:[%s1908_s1 + $0x28] sm:$0xff]  ;;  %v589_v62 = vld [vmem:[%s1913_s6 + $0x18] sm:$0xff]  ;;  %v819_v2 = vld [vmem:[%s1915_s8] sm:$0xff] }
  0x1b   :  { %125 = vperm.xlu0 %1398, %v79_v17   ;;  %115 = vperm.xlu2 %1400, %v77_v18   ;;  %v587_v63 = vld [vmem:[%s1913_s6 + $0x8] sm:$0xff]  ;;  %v821_v3 = vld [vmem:[%s1915_s8 + $0x10] sm:$0xff]  ;;  %v823_v6 = vld [vmem:[%s1915_s8 + $0x20] sm:$0xff] }
  0x1c   :  { %270 = vmatpush.bf16.msra.mxu0 %v1357_v19  ;;  %v820_v1 = vld [vmem:[%s1915_s8 + $0x8] sm:$0xff]  ;;  %v1370_v4 = vld [vmem:[%s1908_s1 + $0x30] sm:$0xff]  ;;  %v822_v7 = vld [vmem:[%s1915_s8 + $0x18] sm:$0xff] }
  0x1d   :  { %v824_v8 = vld [vmem:[%s1915_s8 + $0x28] sm:$0xff]  ;;  %v826_v11 = vld [vmem:[%s1915_s8 + $0x38] sm:$0xff]  ;;  %v825_v12 = vld [vmem:[%s1915_s8 + $0x30] sm:$0xff] }
  0x1e   :  { %v827_v13 = vld [vmem:[%s1915_s8 + $0x40] sm:$0xff]  ;;  %v1371_v14 = vld [vmem:[%s1908_s1 + $0x38] sm:$0xff]  ;;  %v829_v18 = vld [vmem:[%s1915_s8 + $0x50] sm:$0xff] }
  0x1f   :  { %v828_v19 = vld [vmem:[%s1915_s8 + $0x48] sm:$0xff] }
  0x20   :  { %271 = vmatpush.bf16.msra.mxu0 %v1356_v20  ;;  %v830_v20 = vld [vmem:[%s1915_s8 + $0x58] sm:$0xff] }
  0x22   :  { %105 = vperm.xlu1 %1399, %v75_v21  }
  0x23   :  { %100 = vperm.xlu0 %1398, %v74_v22   ;;  %90 = vperm.xlu2 %1400, %v72_v23  }
  0x24   :  { %272 = vmatmul.bf16.vlgmr.msra.gmra.mxu0 %v1364_v24  ;;  %v832_v24 = vld [vmem:[%s1915_s8 + $0x68] sm:$0xff] }
  0x2a   :  { %441 = vperm.xlu1 %1399, %v367_v25   ;;  %v831_v25 = vld [vmem:[%s1915_s8 + $0x60] sm:$0xff] }
  0x2b   :  { %95 = vperm.xlu0 %1398, %v73_v26   ;;  %446 = vperm.xlu2 %1400, %v368_v27   ;;  %v1028_v26 = vld [vmem:[%s1916_s9] sm:$0xff] }
  0x32   :  { %436 = vperm.xlu1 %1399, %v366_v28  }
  0x33   :  { %431 = vperm.xlu0 %1398, %v365_v29   ;;  %421 = vperm.xlu2 %1400, %v363_v30   ;;  %v1030_v30 = vld [vmem:[%s1916_s9 + $0x10] sm:$0xff] }
  0x34   :  { %277 = vmatmul.bf16.gmra.mxu0 %v1365_v31 }
  0x3a   :  { %411 = vperm.xlu1 %1399, %v361_v32   ;;  %v1029_v32 = vld [vmem:[%s1916_s9 + $0x8] sm:$0xff] }
  0x3b   :  { %426 = vperm.xlu0 %1398, %v364_v33   ;;  %416 = vperm.xlu2 %1400, %v362_v34   ;;  %v1031_v33 = vld [vmem:[%s1916_s9 + $0x18] sm:$0xff] }
  0x42   :  { %406 = vperm.xlu1 %1399, %v360_v35  }
  0x43   :  { %401 = vperm.xlu0 %1398, %v359_v36   ;;  %391 = vperm.xlu2 %1400, %v357_v37  }
  0x44   :  { %282 = vmatmul.bf16.gmra.mxu0 %v1366_v38 }
  0x4a   :  { %381 = vperm.xlu1 %1399, %v355_v39  }
  0x4b   :  { %396 = vperm.xlu0 %1398, %v358_v40   ;;  %386 = vperm.xlu2 %1400, %v356_v41   ;;  %v1033_v41 = vld [vmem:[%s1916_s9 + $0x28] sm:$0xff] }
  0x52   :  { %376 = vperm.xlu1 %1399, %v354_v42   ;;  %v1032_v42 = vld [vmem:[%s1916_s9 + $0x20] sm:$0xff] }
  0x53   :  { %371 = vperm.xlu0 %1398, %v353_v43   ;;  %674 = vperm.xlu2 %1400, %v600_v44   ;;  %v1034_v43 = vld [vmem:[%s1916_s9 + $0x30] sm:$0xff] }
  0x54   :  { %287 = vmatmul.bf16.gmra.mxu0 %v1367_v45  ;;  %v1036_v45 = vld [vmem:[%s1916_s9 + $0x40] sm:$0xff] }
  0x5a   :  { %664 = vperm.xlu1 %1399, %v598_v46  }
  0x5b   :  { %679 = vperm.xlu0 %1398, %v601_v47   ;;  %669 = vperm.xlu2 %1400, %v599_v48   ;;  %v1035_v47 = vld [vmem:[%s1916_s9 + $0x38] sm:$0xff]  ;;  %v1037_v48 = vld [vmem:[%s1916_s9 + $0x48] sm:$0xff] }
  0x5d   :  { %v1681_v0 = vpop.permute.xlu2 %140 }
  0x62   :  { %659 = vperm.xlu1 %1399, %v597_v49  }
  0x63   :  { %654 = vperm.xlu0 %1398, %v596_v50   ;;  %644 = vperm.xlu2 %1400, %v594_v51  }
  0x64   :  { %292 = vmatmul.bf16.gmra.mxu0 %v1368_v52 }
  0x65   :  { %v1706_v9 = vpop.permute.xlu2 %145 }
  0x6a   :  { %634 = vperm.xlu1 %1399, %v592_v53  }
  0x6b   :  { %649 = vperm.xlu0 %1398, %v595_v54   ;;  %639 = vperm.xlu2 %1400, %v593_v55   ;;  %v1039_v55 = vld [vmem:[%s1916_s9 + $0x58] sm:$0xff] }
  0x6d   :  { %v1724_v16 = vpop.permute.xlu2 %120 }
  0x72   :  { %629 = vperm.xlu1 %1399, %v591_v56   ;;  %v1038_v56 = vld [vmem:[%s1916_s9 + $0x50] sm:$0xff] }
  0x73   :  { %624 = vperm.xlu0 %1398, %v590_v57   ;;  %614 = vperm.xlu2 %1400, %v588_v58   ;;  %v833_v57 = vld [vmem:[%s1915_s8 + $0x70] sm:$0xff] }
  0x74   :  { %297 = vmatmul.bf16.gmra.mxu0 %v1369_v59  ;;  %v1722_v15 = vpop.permute.xlu1 %150  ;;  %v834_v59 = vld [vmem:[%s1915_s8 + $0x78] sm:$0xff] }
  0x75   :  { %v1670_v60 = vpop.permute.xlu0 %160  ;;  %v116_v22 = vpop.permute.xlu2 %115 }
  0x7a   :  { %604 = vperm.xlu1 %1399, %v586_v61  }
  0x7b   :  { %619 = vperm.xlu0 %1398, %v589_v62   ;;  %609 = vperm.xlu2 %1400, %v587_v63   ;;  %v1040_v62 = vld [vmem:[%s1916_s9 + $0x60] sm:$0xff]  ;;  %v1041_v63 = vld [vmem:[%s1916_s9 + $0x68] sm:$0xff] }
  0x7c   :  { %v1737_v21 = vpop.permute.xlu1 %155 }
  0x7d   :  { %v1695_v5 = vpop.permute.xlu0 %165  ;;  %v91_v29 = vpop.permute.xlu2 %90 }
  0x82   :  { %842 = vperm.xlu1 %1399, %v820_v1  }
  0x83   :  { %837 = vperm.xlu0 %1398, %v819_v2   ;;  %847 = vperm.xlu2 %1400, %v821_v3  }
  0x84   :  { %302 = vmatmul.bf16.gmra.mxu0 %v1370_v4  ;;  %v1748_v28 = vpop.permute.xlu1 %135 }
  0x85   :  { %v1708_v10 = vpop.permute.xlu0 %130 }
  0x8a   :  { %857 = vperm.xlu1 %1399, %v823_v6  }
  0x8b   :  { %852 = vperm.xlu0 %1398, %v822_v7   ;;  %862 = vperm.xlu2 %1400, %v824_v8   ;;  %v1043_v7 = vld [vmem:[%s1916_s9 + $0x78] sm:$0xff]  ;;  %v1042_v8 = vld [vmem:[%s1916_s9 + $0x70] sm:$0xff] }
  0x8c   :  { %v111_v40 = vpop.permute.xlu1 %110 }
  0x8d   :  { %v1726_v17 = vpop.permute.xlu0 %125 }
  0x92   :  { %872 = vperm.xlu1 %1399, %v826_v11  }
  0x93   :  { %867 = vperm.xlu0 %1398, %v825_v12   ;;  %877 = vperm.xlu2 %1400, %v827_v13  }
  0x94   :  { %307 = vmatmul.bf16.gmra.mxu0 %v1371_v14  ;;  %v106_v49 = vpop.permute.xlu1 %105 }
  0x95   :  { %v101_v23 = vpop.permute.xlu0 %100 }
  0x9a   :  { %887 = vperm.xlu1 %1399, %v829_v18  }
  0x9b   :  { %882 = vperm.xlu0 %1398, %v828_v19   ;;  %892 = vperm.xlu2 %1400, %v830_v20  }
  0x9d   :  { %v96_v34 = vpop.permute.xlu0 %95 }
  0xa1   :  { %v273_v27 = vpop.f32.mrf.mxu0 }
  0xa2   :  { %902 = vperm.xlu1 %1399, %v832_v24   ;;  %v274_v31 = vadd.f32 %v273_v27, %v91_v29 }
  0xa3   :  { %897 = vperm.xlu0 %1398, %v831_v25   ;;  %1046 = vperm.xlu2 %1400, %v1028_v26  }
  0xa4   :  { %v313_v37 = vmax.f32 %v274_v31, 0.0 }
  0xa9   :  { %v275_v35 = vpop.f32.mrf.mxu0 }
  0xaa   :  { %v276_v36 = vadd.f32 %v275_v35, %v96_v34  ;;  %1056 = vperm.xlu1 %1399, %v1030_v30  }
  0xab   :  { %1051 = vperm.xlu0 %1398, %v1029_v32   ;;  %1061 = vperm.xlu2 %1400, %v1031_v33  }
  0xac   :  { %v314_v38 = vmax.f32 %v276_v36, 0.0 }
  0xae   :  { %v1759_v39 = vpack.c.bf16 %v314_v38, %v313_v37 }
  0xb1   :  { %v278_v44 = vpop.f32.mrf.mxu0 }
  0xb2   :  { %1071 = vperm.xlu1 %1399, %v1033_v41   ;;  %v279_v46 = vadd.f32 %v278_v44, %v101_v23 }
  0xb3   :  { %1066 = vperm.xlu0 %1398, %v1032_v42   ;;  %1076 = vperm.xlu2 %1400, %v1034_v43  }
  0xb4   :  { %v315_v52 = vmax.f32 %v279_v46, 0.0  ;;  %v1377_v46 = vld [vmem:[%s1910_s3 + $0x28] sm:$0xff] }
  0xb9   :  { %v280_v50 = vpop.f32.mrf.mxu0 }
  0xba   :  { %v281_v51 = vadd.f32 %v280_v50, %v106_v49  ;;  %1086 = vperm.xlu1 %1399, %v1036_v45   ;;  %v1378_v49 = vld [vmem:[%s1910_s3 + $0x30] sm:$0xff] }
  0xbb   :  { %1081 = vperm.xlu0 %1398, %v1035_v47   ;;  %1091 = vperm.xlu2 %1400, %v1037_v48   ;;  %v442_v47 = vpop.permute.xlu1 %441  ;;  %v432_v48 = vpop.permute.xlu0 %431 }
  0xbc   :  { %v316_v53 = vmax.f32 %v281_v51, 0.0 }
  0xbe   :  { %v1779_v54 = vpack.c.bf16 %v316_v53, %v315_v52  ;;  %v1379_v53 = vld [vmem:[%s1910_s3 + $0x38] sm:$0xff] }
  0xc1   :  { %v283_v58 = vpop.f32.mrf.mxu0 }
  0xc2   :  { %1101 = vperm.xlu1 %1399, %v1039_v55   ;;  %v284_v61 = vadd.f32 %v283_v58, %v111_v40 }
  0xc3   :  { %1096 = vperm.xlu0 %1398, %v1038_v56   ;;  %907 = vperm.xlu2 %1400, %v833_v57   ;;  %v437_v50 = vpop.permute.xlu1 %436  ;;  %v427_v51 = vpop.permute.xlu0 %426 }
  0xc4   :  { %v317_v3 = vmax.f32 %v284_v61, 0.0 }
  0xc9   :  { %v285_v1 = vpop.f32.mrf.mxu0 }
  0xca   :  { %v286_v2 = vadd.f32 %v285_v1, %v116_v22  ;;  %912 = vperm.xlu1 %1399, %v834_v59  }
  0xcb   :  { %1106 = vperm.xlu0 %1398, %v1040_v62   ;;  %1111 = vperm.xlu2 %1400, %v1041_v63   ;;  %v1838_v52 = vpop.permute.xlu1 %411  ;;  %v402_v55 = vpop.permute.xlu0 %401 }
  0xcc   :  { %v318_v4 = vmax.f32 %v286_v2, 0.0 }
  0xce   :  { %v331_v6 = vpack.c.bf16 %v318_v4, %v317_v3 }
  0xd1   :  { %v288_v11 = vpop.f32.mrf.mxu0 }
  0xd2   :  { %1121 = vperm.xlu1 %1399, %v1043_v7   ;;  %v289_v12 = vadd.f32 %v288_v11, %v1724_v16 }
  0xd3   :  { %1116 = vperm.xlu0 %1398, %v1042_v8   ;;  %v407_v56 = vpop.permute.xlu1 %406  ;;  %v397_v58 = vpop.permute.xlu0 %396 }
  0xd4   :  { %v319_v18 = vmax.f32 %v289_v12, 0.0 }
  0xd9   :  { %v290_v13 = vpop.f32.mrf.mxu0 }
  0xda   :  { %v291_v14 = vadd.f32 %v290_v13, %v1726_v17 }
  0xdb   :  { %v382_v59 = vpop.permute.xlu1 %381  ;;  %v372_v63 = vpop.permute.xlu0 %371 }
  0xdc   :  { %v320_v19 = vmax.f32 %v291_v14, 0.0 }
  0xde   :  { %v332_v20 = vpack.c.bf16 %v320_v19, %v319_v18 }
  0xe1   :  { %v293_v22 = vpop.f32.mrf.mxu0 }
  0xe3   :  { %v377_v2 = vpop.permute.xlu1 %376 }
  0xe9   :  { %v295_v23 = vpop.f32.mrf.mxu0 }
  0xea   :  { %v296_v41 = vadd.f32 %v295_v23, %v1748_v28  ;;  %v1375_v28 = vld [vmem:[%s1910_s3 + $0x18] sm:$0xff] }
  0xf1   :  { %v298_v24 = vpop.f32.mrf.mxu0 }
  0xf2   :  { %v299_v38 = vadd.f32 %v298_v24, %v1681_v0  ;;  %v1372_v0 = vld [vmem:[%s1910_s3] sm:$0xff] }
  0xf4   :  { %v323_v43 = vmax.f32 %v299_v38, 0.0 }
  0xf9   :  { %v300_v25 = vpop.f32.mrf.mxu0 }
  0xfa   :  { %v301_v35 = vadd.f32 %v300_v25, %v1706_v9  ;;  %v1373_v9 = vld [vmem:[%s1910_s3 + $0x8] sm:$0xff] }
 0x101   :  { %v303_v26 = vpop.f32.mrf.mxu0 }
 0x102   :  { %v304_v33 = vadd.f32 %v303_v26, %v1722_v15 }
 0x104   :  { %v325_v40 = vmax.f32 %v304_v33, 0.0 }
 0x109   :  { %v305_v27 = vpop.f32.mrf.mxu0 }
 0x10a   :  { %v306_v32 = vadd.f32 %v305_v27, %v1737_v21  ;;  %v294_v21 = vadd.f32 %v293_v22, %v1708_v10  ;;  %v1374_v10 = vld [vmem:[%s1910_s3 + $0x10] sm:$0xff] }
 0x10c   :  { %v326_v36 = vmax.f32 %v306_v32, 0.0  ;;  %v321_v44 = vmax.f32 %v294_v21, 0.0 }
 0x10e   :  { %v335_v42 = vpack.c.bf16 %v326_v36, %v325_v40 }
 0x111   :  { %v308_v29 = vpop.f32.mrf.mxu0 }
 0x112   :  { %v309_v30 = vadd.f32 %v308_v29, %v1670_v60  ;;  %v324_v60 = vmax.f32 %v301_v35, 0.0 }
 0x114   :  { %v327_v17 = vmax.f32 %v309_v30, 0.0  ;;  %v334_v15 = vpack.c.bf16 %v324_v60, %v323_v43 }
 0x119   :  { %v310_v31 = vpop.f32.mrf.mxu0 }
 0x11a   :  { %v311_v16 = vadd.f32 %v310_v31, %v1695_v5  ;;  %v322_v5 = vmax.f32 %v296_v41, 0.0 }
 0x11c   :  { %v328_v34 = vmax.f32 %v311_v16, 0.0  ;;  %v333_v45 = vpack.c.bf16 %v322_v5, %v321_v44 }
 0x11e   :  { %v336_v37 = vpack.c.bf16 %v328_v34, %v327_v17 }
 0x120   :  { %497 = vmatpush.bf16.msra.mxu1 %v336_v37 }
 0x124   :  { %498 = vmatpush.bf16.msra.mxu1 %v335_v42 }
 0x128   :  { %499 = vmatpush.bf16.msra.mxu1 %v334_v15 }
 0x12c   :  { %500 = vmatpush.bf16.msra.mxu1 %v333_v45 }
 0x130   :  { %501 = vmatpush.bf16.msra.mxu1 %v332_v20 }
 0x134   :  { %502 = vmatpush.bf16.msra.mxu1 %v331_v6 }
 0x138   :  { %503 = vmatpush.bf16.msra.mxu1 %v1779_v54  ;;  %v447_v54 = vpop.permute.xlu2 %446 }
 0x13c   :  { %504 = vmatpush.bf16.msra.mxu1 %v1759_v39  ;;  %v1376_v39 = vld [vmem:[%s1910_s3 + $0x20] sm:$0xff] }
 0x13f   :  { %505 = vmatmul.bf16.vlgmr.msra.gmra.mxu1 %v1372_v0 }
 0x140   :  { %v422_v57 = vpop.permute.xlu2 %421 }
 0x148   :  { %v417_v62 = vpop.permute.xlu2 %416 }
 0x14f   :  { %510 = vmatmul.bf16.gmra.mxu1 %v1373_v9 }
 0x150   :  { %v392_v11 = vpop.permute.xlu2 %391 }
 0x158   :  { %v387_v14 = vpop.permute.xlu2 %386 }
 0x15f   :  { %515 = vmatmul.bf16.gmra.mxu1 %v1374_v10 }
 0x16f   :  { %520 = vmatmul.bf16.gmra.mxu1 %v1375_v28 }
 0x17f   :  { %525 = vmatmul.bf16.gmra.mxu1 %v1376_v39 }
 0x18f   :  { %530 = vmatmul.bf16.gmra.mxu1 %v1377_v46 }
 0x19f   :  { %535 = vmatmul.bf16.gmra.mxu1 %v1378_v49 }
 0x1af   :  { %540 = vmatmul.bf16.gmra.mxu1 %v1379_v53 }
 0x1bc   :  { %v506_v61 = vpop.f32.mrf.mxu1 }
 0x1bd   :  { %v507_v1 = vadd.f32 %v506_v61, %v372_v63  ;;  %v1385_v63 = vld [vmem:[%s1912_s5 + $0x28] sm:$0xff] }
 0x1bf   :  { %v546_v6 = vmax.f32 %v507_v1, 0.0  ;;  %v675_v1 = vpop.permute.xlu2 %674 }
 0x1c4   :  { %v508_v3 = vpop.f32.mrf.mxu1 }
 0x1c5   :  { %v509_v4 = vadd.f32 %v508_v3, %v377_v2  ;;  %v1386_v2 = vld [vmem:[%s1912_s5 + $0x30] sm:$0xff]  ;;  %v665_v3 = vpop.permute.xlu1 %664 }
 0x1c7   :  { %v547_v7 = vmax.f32 %v509_v4, 0.0  ;;  %v670_v4 = vpop.permute.xlu2 %669 }
 0x1c9   :  { %v562_v8 = vpack.c.bf16 %v547_v7, %v546_v6  ;;  %v1387_v7 = vld [vmem:[%s1912_s5 + $0x38] sm:$0xff] }
 0x1cc   :  { %v511_v12 = vpop.f32.mrf.mxu1 }
 0x1cd   :  { %v512_v13 = vadd.f32 %v511_v12, %v382_v59  ;;  %v660_v6 = vpop.permute.xlu1 %659 }
 0x1cf   :  { %v548_v20 = vmax.f32 %v512_v13, 0.0 }
 0x1d4   :  { %v513_v18 = vpop.f32.mrf.mxu1 }
 0x1d5   :  { %v514_v19 = vadd.f32 %v513_v18, %v387_v14  ;;  %v635_v12 = vpop.permute.xlu1 %634 }
 0x1d7   :  { %v549_v22 = vmax.f32 %v514_v19, 0.0 }
 0x1d9   :  { %v563_v23 = vpack.c.bf16 %v549_v22, %v548_v20 }
 0x1dc   :  { %v516_v24 = vpop.f32.mrf.mxu1 }
 0x1dd   :  { %v517_v25 = vadd.f32 %v516_v24, %v392_v11  ;;  %v680_v11 = vpop.permute.xlu0 %679  ;;  %v630_v18 = vpop.permute.xlu1 %629 }
 0x1df   :  { %v550_v29 = vmax.f32 %v517_v25, 0.0 }
 0x1e4   :  { %v518_v26 = vpop.f32.mrf.mxu1 }
 0x1e5   :  { %v519_v27 = vadd.f32 %v518_v26, %v397_v58  ;;  %v655_v14 = vpop.permute.xlu0 %654 }
 0x1e7   :  { %v551_v30 = vmax.f32 %v519_v27, 0.0 }
 0x1e9   :  { %v564_v31 = vpack.c.bf16 %v551_v30, %v550_v29 }
 0x1ec   :  { %v521_v32 = vpop.f32.mrf.mxu1 }
 0x1ed   :  { %v522_v16 = vadd.f32 %v521_v32, %v402_v55  ;;  %v650_v22 = vpop.permute.xlu0 %649 }
 0x1ef   :  { %v552_v34 = vmax.f32 %v522_v16, 0.0 }
 0x1f4   :  { %v523_v33 = vpop.f32.mrf.mxu1 }
 0x1f5   :  { %v524_v17 = vadd.f32 %v523_v33, %v407_v56  ;;  %v625_v32 = vpop.permute.xlu0 %624 }
 0x1f7   :  { %v553_v35 = vmax.f32 %v524_v17, 0.0 }
 0x1f9   :  { %v565_v36 = vpack.c.bf16 %v553_v35, %v552_v34 }
 0x1fc   :  { %v526_v37 = vpop.f32.mrf.mxu1 }
 0x1fd   :  { %v527_v58 = vadd.f32 %v526_v37, %v1838_v52  ;;  %v1381_v52 = vld [vmem:[%s1912_s5 + $0x8] sm:$0xff]  ;;  %v620_v17 = vpop.permute.xlu0 %619 }
 0x204   :  { %v528_v38 = vpop.f32.mrf.mxu1 }
 0x205   :  { %v529_v53 = vadd.f32 %v528_v38, %v417_v62  ;;  %v1384_v62 = vld [vmem:[%s1912_s5 + $0x20] sm:$0xff] }
 0x20c   :  { %v531_v40 = vpop.f32.mrf.mxu1 }
 0x20d   :  { %v532_v46 = vadd.f32 %v531_v40, %v422_v57  ;;  %v1383_v57 = vld [vmem:[%s1912_s5 + $0x18] sm:$0xff] }
 0x20f   :  { %v556_v59 = vmax.f32 %v532_v46, 0.0 }
 0x214   :  { %v533_v41 = vpop.f32.mrf.mxu1 }
 0x215   :  { %v534_v10 = vadd.f32 %v533_v41, %v427_v51  ;;  %v1380_v51 = vld [vmem:[%s1912_s5] sm:$0xff] }
 0x217   :  { %v557_v55 = vmax.f32 %v534_v10, 0.0 }
 0x219   :  { %v567_v61 = vpack.c.bf16 %v557_v55, %v556_v59 }
 0x21c   :  { %v536_v60 = vpop.f32.mrf.mxu1 }
 0x21d   :  { %v537_v45 = vadd.f32 %v536_v60, %v432_v48 }
 0x21f   :  { %v558_v49 = vmax.f32 %v537_v45, 0.0 }
 0x224   :  { %v538_v42 = vpop.f32.mrf.mxu1 }
 0x225   :  { %v539_v15 = vadd.f32 %v538_v42, %v437_v50  ;;  %v554_v50 = vmax.f32 %v527_v58, 0.0 }
 0x227   :  { %v559_v28 = vmax.f32 %v539_v15, 0.0 }
 0x229   :  { %v568_v56 = vpack.c.bf16 %v559_v28, %v558_v49 }
 0x22c   :  { %v541_v21 = vpop.f32.mrf.mxu1 }
 0x22d   :  { %v542_v43 = vadd.f32 %v541_v21, %v442_v47  ;;  %v555_v47 = vmax.f32 %v529_v53, 0.0 }
 0x22f   :  { %v560_v0 = vmax.f32 %v542_v43, 0.0  ;;  %v566_v48 = vpack.c.bf16 %v555_v47, %v554_v50 }
 0x234   :  { %v543_v5 = vpop.f32.mrf.mxu1 }
 0x235   :  { %v544_v44 = vadd.f32 %v543_v5, %v447_v54  ;;  %v1382_v54 = vld [vmem:[%s1912_s5 + $0x10] sm:$0xff] }
 0x237   :  { %v561_v9 = vmax.f32 %v544_v44, 0.0 }
 0x239   :  { %v569_v39 = vpack.c.bf16 %v561_v9, %v560_v0 }
 0x23b   :  { %730 = vmatpush.bf16.msra.mxu2 %v569_v39 }
 0x23f   :  { %731 = vmatpush.bf16.msra.mxu2 %v568_v56 }
 0x243   :  { %732 = vmatpush.bf16.msra.mxu2 %v567_v61 }
 0x247   :  { %733 = vmatpush.bf16.msra.mxu2 %v566_v48 }
 0x24b   :  { %734 = vmatpush.bf16.msra.mxu2 %v565_v36 }
 0x24f   :  { %735 = vmatpush.bf16.msra.mxu2 %v564_v31 }
 0x253   :  { %736 = vmatpush.bf16.msra.mxu2 %v563_v23  ;;  %v605_v23 = vpop.permute.xlu1 %604 }
 0x257   :  { %737 = vmatpush.bf16.msra.mxu2 %v562_v8  ;;  %v1868_v8 = vpop.permute.xlu2 %644 }
 0x25a   :  { %738 = vmatmul.bf16.vlgmr.msra.gmra.mxu2 %v1380_v51 }
 0x25f   :  { %v640_v13 = vpop.permute.xlu2 %639 }
 0x267   :  { %v615_v19 = vpop.permute.xlu2 %614 }
 0x26a   :  { %743 = vmatmul.bf16.gmra.mxu2 %v1381_v52 }
 0x26f   :  { %v610_v25 = vpop.permute.xlu2 %609 }
 0x27a   :  { %748 = vmatmul.bf16.gmra.mxu2 %v1382_v54 }
 0x28a   :  { %753 = vmatmul.bf16.gmra.mxu2 %v1383_v57 }
 0x29a   :  { %758 = vmatmul.bf16.gmra.mxu2 %v1384_v62 }
 0x2aa   :  { %763 = vmatmul.bf16.gmra.mxu2 %v1385_v63 }
 0x2ba   :  { %768 = vmatmul.bf16.gmra.mxu2 %v1386_v2 }
 0x2ca   :  { %773 = vmatmul.bf16.gmra.mxu2 %v1387_v7 }
 0x2dd   :  { %v739_v20 = vpop.f32.mrf.mxu2 }
 0x2de   :  { %v740_v24 = vadd.f32 %v739_v20, %v605_v23  ;;  %v1393_v23 = vld [vmem:[%s1914_s7 + $0x28] sm:$0xff] }
 0x2e0   :  { %v779_v29 = vmax.f32 %v740_v24, 0.0  ;;  %v1394_v24 = vld [vmem:[%s1914_s7 + $0x30] sm:$0xff] }
 0x2e5   :  { %v741_v26 = vpop.f32.mrf.mxu2 }
 0x2e6   :  { %v742_v27 = vadd.f32 %v741_v26, %v610_v25  ;;  %v838_v25 = vpop.permute.xlu0 %837  ;;  %v843_v26 = vpop.permute.xlu1 %842 }
 0x2e8   :  { %v780_v30 = vmax.f32 %v742_v27, 0.0  ;;  %v848_v27 = vpop.permute.xlu2 %847 }
 0x2ea   :  { %v795_v31 = vpack.c.bf16 %v780_v30, %v779_v29  ;;  %v1395_v30 = vld [vmem:[%s1914_s7 + $0x38] sm:$0xff] }
 0x2ed   :  { %v744_v16 = vpop.f32.mrf.mxu2 }
 0x2ee   :  { %v745_v33 = vadd.f32 %v744_v16, %v615_v19  ;;  %v853_v29 = vpop.permute.xlu0 %852 }
 0x2f0   :  { %v781_v36 = vmax.f32 %v745_v33, 0.0 }
 0x2f5   :  { %v746_v34 = vpop.f32.mrf.mxu2 }
 0x2f6   :  { %v747_v35 = vadd.f32 %v746_v34, %v620_v17  ;;  %v868_v16 = vpop.permute.xlu0 %867 }
 0x2f8   :  { %v782_v37 = vmax.f32 %v747_v35, 0.0 }
 0x2fa   :  { %v796_v38 = vpack.c.bf16 %v782_v37, %v781_v36 }
 0x2fd   :  { %v749_v40 = vpop.f32.mrf.mxu2 }
 0x2fe   :  { %v750_v41 = vadd.f32 %v749_v40, %v625_v32  ;;  %v863_v32 = vpop.permute.xlu2 %862  ;;  %v883_v34 = vpop.permute.xlu0 %882 }
 0x300   :  { %v783_v21 = vmax.f32 %v750_v41, 0.0 }
 0x305   :  { %v751_v60 = vpop.f32.mrf.mxu2 }
 0x306   :  { %v752_v42 = vadd.f32 %v751_v60, %v630_v18  ;;  %v878_v17 = vpop.permute.xlu2 %877 }
 0x308   :  { %v784_v43 = vmax.f32 %v752_v42, 0.0 }
 0x30a   :  { %v797_v5 = vpack.c.bf16 %v784_v43, %v783_v21 }
 0x30d   :  { %v754_v15 = vpop.f32.mrf.mxu2 }
 0x30e   :  { %v755_v44 = vadd.f32 %v754_v15, %v635_v12  ;;  %v893_v37 = vpop.permute.xlu2 %892 }
 0x310   :  { %v785_v9 = vmax.f32 %v755_v44, 0.0 }
 0x315   :  { %v756_v45 = vpop.f32.mrf.mxu2 }
 0x316   :  { %v757_v0 = vadd.f32 %v756_v45, %v640_v13 }
 0x318   :  { %v786_v10 = vmax.f32 %v757_v0, 0.0 }
 0x31a   :  { %v798_v28 = vpack.c.bf16 %v786_v10, %v785_v9 }
 0x31d   :  { %v759_v39 = vpop.f32.mrf.mxu2 }
 0x31e   :  { %v760_v18 = vadd.f32 %v759_v39, %v1868_v8  ;;  %v1389_v8 = vld [vmem:[%s1914_s7 + $0x8] sm:$0xff] }
 0x325   :  { %v761_v46 = vpop.f32.mrf.mxu2 }
 0x326   :  { %v762_v7 = vadd.f32 %v761_v46, %v650_v22  ;;  %v1392_v22 = vld [vmem:[%s1914_s7 + $0x20] sm:$0xff] }
 0x32d   :  { %v764_v49 = vpop.f32.mrf.mxu2 }
 0x32e   :  { %v765_v63 = vadd.f32 %v764_v49, %v655_v14  ;;  %v1391_v14 = vld [vmem:[%s1914_s7 + $0x18] sm:$0xff] }
 0x330   :  { %v789_v19 = vmax.f32 %v765_v63, 0.0 }
 0x335   :  { %v766_v53 = vpop.f32.mrf.mxu2 }
 0x336   :  { %v767_v54 = vadd.f32 %v766_v53, %v660_v6  ;;  %v1388_v6 = vld [vmem:[%s1914_s7] sm:$0xff] }
 0x338   :  { %v790_v12 = vmax.f32 %v767_v54, 0.0 }
 0x33a   :  { %v800_v20 = vpack.c.bf16 %v790_v12, %v789_v19 }
 0x33d   :  { %v769_v55 = vpop.f32.mrf.mxu2 }
 0x33e   :  { %v770_v48 = vadd.f32 %v769_v55, %v665_v3 }
 0x340   :  { %v791_v2 = vmax.f32 %v770_v48, 0.0 }
 0x345   :  { %v771_v56 = vpop.f32.mrf.mxu2 }
 0x346   :  { %v772_v61 = vadd.f32 %v771_v56, %v670_v4  ;;  %v787_v4 = vmax.f32 %v760_v18, 0.0 }
 0x348   :  { %v792_v57 = vmax.f32 %v772_v61, 0.0 }
 0x34a   :  { %v801_v13 = vpack.c.bf16 %v792_v57, %v791_v2 }
 0x34d   :  { %v774_v58 = vpop.f32.mrf.mxu2 }
 0x34e   :  { %v775_v59 = vadd.f32 %v774_v58, %v675_v1  ;;  %v788_v1 = vmax.f32 %v762_v7, 0.0 }
 0x350   :  { %v793_v51 = vmax.f32 %v775_v59, 0.0  ;;  %v799_v3 = vpack.c.bf16 %v788_v1, %v787_v4 }
 0x355   :  { %v776_v47 = vpop.f32.mrf.mxu2 }
 0x356   :  { %v777_v50 = vadd.f32 %v776_v47, %v680_v11  ;;  %v1390_v11 = vld [vmem:[%s1914_s7 + $0x10] sm:$0xff] }
 0x358   :  { %v794_v52 = vmax.f32 %v777_v50, 0.0 }
 0x35a   :  { %v802_v62 = vpack.c.bf16 %v794_v52, %v793_v51 }
 0x35c   :  { %963 = vmatpush.bf16.msra.mxu3 %v802_v62 }
 0x360   :  { %964 = vmatpush.bf16.msra.mxu3 %v801_v13 }
 0x364   :  { %965 = vmatpush.bf16.msra.mxu3 %v800_v20 }
 0x368   :  { %966 = vmatpush.bf16.msra.mxu3 %v799_v3 }
 0x36c   :  { %967 = vmatpush.bf16.msra.mxu3 %v798_v28 }
 0x370   :  { %968 = vmatpush.bf16.msra.mxu3 %v797_v5  ;;  %v1047_v5 = vpop.permute.xlu2 %1046 }
 0x374   :  { %969 = vmatpush.bf16.msra.mxu3 %v796_v38  ;;  %v1895_v38 = vpop.permute.xlu0 %897 }
 0x378   :  { %970 = vmatpush.bf16.msra.mxu3 %v795_v31  ;;  %v858_v31 = vpop.permute.xlu1 %857  ;;  %v1062_v58 = vpop.permute.xlu2 %1061 }
 0x37b   :  { %971 = vmatmul.bf16.vlgmr.msra.gmra.mxu3 %v1388_v6 }
 0x37c   :  { %v1052_v15 = vpop.permute.xlu0 %1051 }
 0x380   :  { %v873_v33 = vpop.permute.xlu1 %872  ;;  %v1077_v18 = vpop.permute.xlu2 %1076 }
 0x384   :  { %v1067_v51 = vpop.permute.xlu0 %1066 }
 0x388   :  { %v888_v35 = vpop.permute.xlu1 %887 }
 0x38b   :  { %976 = vmatmul.bf16.gmra.mxu3 %v1389_v8  ;;  %v1092_v8 = vpop.permute.xlu2 %1091 }
 0x38c   :  { %v1082_v1 = vpop.permute.xlu0 %1081 }
 0x390   :  { %v1897_v21 = vpop.permute.xlu1 %902 }
 0x398   :  { %v1057_v39 = vpop.permute.xlu1 %1056 }
 0x39b   :  { %981 = vmatmul.bf16.gmra.mxu3 %v1390_v11 }
 0x3a0   :  { %v1072_v13 = vpop.permute.xlu1 %1071 }
 0x3a8   :  { %v1087_v20 = vpop.permute.xlu1 %1086 }
 0x3ab   :  { %986 = vmatmul.bf16.gmra.mxu3 %v1391_v14 }
 0x3bb   :  { %991 = vmatmul.bf16.gmra.mxu3 %v1392_v22  ;;  %v1097_v22 = vpop.permute.xlu0 %1096 }
 0x3cb   :  { %996 = vmatmul.bf16.gmra.mxu3 %v1393_v23 }
 0x3db   :  { %1001 = vmatmul.bf16.gmra.mxu3 %v1394_v24 }
 0x3eb   :  { %1006 = vmatmul.bf16.gmra.mxu3 %v1395_v30 }
 0x3fe   :  { %v972_v36 = vpop.f32.mrf.mxu3 }
 0x3ff   :  { %v973_v40 = vadd.f32 %v972_v36, %v838_v25 }
 0x401   :  { %v1012_v60 = vmax.f32 %v973_v40, 0.0 }
 0x403   :  { %v1124_v44 = vmul.f32 %v1047_v5, %v1012_v60 }
 0x406   :  { %v974_v41 = vpop.f32.mrf.mxu3 }
 0x407   :  { %v975_v42 = vadd.f32 %v974_v41, %v843_v26 }
 0x409   :  { %v1013_v43 = vmax.f32 %v975_v42, 0.0 }
 0x40b   :  { %v1125_v45 = vmul.f32 %v1052_v15, %v1013_v43  ;;  %v908_v43 = vpop.permute.xlu2 %907 }
 0x40d   :  { %v1140_v0 = vadd.f32 %v1125_v45, %v1124_v44  ;;  %v1107_v44 = vpop.permute.xlu0 %1106 }
 0x40e   :  { %v977_v9 = vpop.f32.mrf.mxu3 }
 0x40f   :  { %v978_v10 = vadd.f32 %v977_v9, %v848_v27 }
 0x411   :  { %v1014_v28 = vmax.f32 %v978_v10, 0.0 }
 0x413   :  { %v1126_v46 = vmul.f32 %v1057_v39, %v1014_v28 }
 0x415   :  { %v1141_v49 = vadd.f32 %v1140_v0, %v1126_v46 }
 0x416   :  { %v979_v53 = vpop.f32.mrf.mxu3 }
 0x417   :  { %v980_v55 = vadd.f32 %v979_v53, %v853_v29  ;;  %v1102_v29 = vpop.permute.xlu1 %1101 }
 0x419   :  { %v1015_v56 = vmax.f32 %v980_v55, 0.0 }
 0x41b   :  { %v1127_v59 = vmul.f32 %v1062_v58, %v1015_v56 }
 0x41d   :  { %v1142_v47 = vadd.f32 %v1141_v49, %v1127_v59  ;;  %v1112_v59 = vpop.permute.xlu2 %1111 }
 0x41e   :  { %v982_v61 = vpop.f32.mrf.mxu3 }
 0x41f   :  { %v983_v50 = vadd.f32 %v982_v61, %v858_v31  ;;  %v913_v46 = vpop.permute.xlu1 %912  ;;  %v1117_v61 = vpop.permute.xlu0 %1116 }
 0x421   :  { %v1016_v48 = vmax.f32 %v983_v50, 0.0 }
 0x423   :  { %v1128_v52 = vmul.f32 %v1067_v51, %v1016_v48 }
 0x425   :  { %v1143_v54 = vadd.f32 %v1142_v47, %v1128_v52 }
 0x426   :  { %v984_v57 = vpop.f32.mrf.mxu3 }
 0x427   :  { %v985_v4 = vadd.f32 %v984_v57, %v863_v32  ;;  %v1122_v57 = vpop.permute.xlu1 %1121 }
 0x429   :  { %v1017_v11 = vmax.f32 %v985_v4, 0.0 }
 0x42b   :  { %v1129_v25 = vmul.f32 %v1072_v13, %v1017_v11 }
 0x42d   :  { %v1144_v41 = vadd.f32 %v1143_v54, %v1129_v25 }
 0x42e   :  { %v987_v62 = vpop.f32.mrf.mxu3 }
 0x42f   :  { %v988_v6 = vadd.f32 %v987_v62, %v868_v16 }
 0x431   :  { %v1018_v23 = vmax.f32 %v988_v6, 0.0 }
 0x433   :  { %v1130_v31 = vmul.f32 %v1077_v18, %v1018_v23 }
 0x435   :  { %v1145_v16 = vadd.f32 %v1144_v41, %v1130_v31 }
 0x436   :  { %v989_v63 = vpop.f32.mrf.mxu3 }
 0x437   :  { %v990_v14 = vadd.f32 %v989_v63, %v873_v33 }
 0x439   :  { %v1019_v26 = vmax.f32 %v990_v14, 0.0 }
 0x43b   :  { %v1131_v60 = vmul.f32 %v1082_v1, %v1019_v26  ;;  %v1162_v1 = vstv %s1917_s10  ;;  %s1187_s10 = sshll.u32 %s1918_s11, 4  ;;  %s1188_s10 = int_to_ptr.hbm [resolvable:$true] %s1187_s10 }
 0x43e   :  { %v992_v2 = vpop.f32.mrf.mxu3 }
 0x43f   :  { %v993_v24 = vadd.f32 %v992_v2, %v878_v17  ;;  %v1146_v17 = vadd.f32 %v1145_v16, %v1131_v60 }
 0x441   :  { %v1020_v36 = vmax.f32 %v993_v24, 0.0 }
 0x443   :  { %v1132_v5 = vmul.f32 %v1087_v20, %v1020_v36 }
 0x445   :  { %v1147_v10 = vadd.f32 %v1146_v17, %v1132_v5 }
 0x446   :  { %v994_v7 = vpop.f32.mrf.mxu3 }
 0x447   :  { %v995_v27 = vadd.f32 %v994_v7, %v883_v34 }
 0x449   :  { %v1021_v42 = vmax.f32 %v995_v27, 0.0 }
 0x44b   :  { %v1133_v45 = vmul.f32 %v1092_v8, %v1021_v42 }
 0x44d   :  { %v1148_v49 = vadd.f32 %v1147_v10, %v1133_v45 }
 0x44e   :  { %v997_v12 = vpop.f32.mrf.mxu3 }
 0x44f   :  { %v998_v40 = vadd.f32 %v997_v12, %v888_v35 }
 0x451   :  { %v1022_v15 = vmax.f32 %v998_v40, 0.0 }
 0x453   :  { %v1134_v28 = vmul.f32 %v1097_v22, %v1022_v15 }
 0x455   :  { %v1149_v55 = vadd.f32 %v1148_v49, %v1134_v28 }
 0x456   :  { %v999_v19 = vpop.f32.mrf.mxu3 }
 0x457   :  { %v1000_v32 = vadd.f32 %v999_v19, %v893_v37 }
 0x459   :  { %v1023_v0 = vmax.f32 %v1000_v32, 0.0 }
 0x45b   :  { %v1135_v37 = vmul.f32 %v1102_v29, %v1023_v0 }
 0x45e   :  { %v1002_v3 = vpop.f32.mrf.mxu3 }
 0x45f   :  { %v1003_v33 = vadd.f32 %v1002_v3, %v1895_v38  ;;  %v1150_v38 = vadd.f32 %v1149_v55, %v1135_v37 }
 0x461   :  { %v1024_v35 = vmax.f32 %v1003_v33, 0.0 }
 0x463   :  { %v1136_v56 = vmul.f32 %v1107_v44, %v1024_v35 }
 0x465   :  { %v1151_v48 = vadd.f32 %v1150_v38, %v1136_v56 }
 0x466   :  { %v1004_v30 = vpop.f32.mrf.mxu3 }
 0x467   :  { %v1005_v34 = vadd.f32 %v1004_v30, %v1897_v21 }
 0x469   :  { %v1025_v53 = vmax.f32 %v1005_v34, 0.0 }
 0x46b   :  { %v1137_v47 = vmul.f32 %v1112_v59, %v1025_v53 }
 0x46d   :  { %v1152_v52 = vadd.f32 %v1151_v48, %v1137_v47 }
 0x46e   :  { %v1007_v9 = vpop.f32.mrf.mxu3 }
 0x46f   :  { %v1008_v39 = vadd.f32 %v1007_v9, %v908_v43 }
 0x471   :  { %v1026_v58 = vmax.f32 %v1008_v39, 0.0 }
 0x473   :  { %v1138_v51 = vmul.f32 %v1117_v61, %v1026_v58 }
 0x475   :  { %v1153_v62 = vadd.f32 %v1152_v52, %v1138_v51 }
 0x476   :  { %v1009_v50 = vpop.f32.mrf.mxu3 }
 0x477   :  { %v1010_v21 = vadd.f32 %v1009_v50, %v913_v46 }
 0x479   :  { %v1027_v54 = vmax.f32 %v1010_v21, 0.0 }
 0x47b   :  { %v1139_v63 = vmul.f32 %v1122_v57, %v1027_v54 }
 0x47d   :  { %v1154_v2 = vadd.f32 %v1153_v62, %v1139_v63 }
 0x47f   :  { %v1155_v7 = vrot.slane %v1154_v2, 4 }
 0x481   :  { %v1156_v12 = vadd.f32 %v1155_v7, %v1154_v2 }
 0x483   :  { %v1157_v13 = vrot.slane %v1156_v12, 2 }
 0x485   :  { %v1158_v18 = vadd.f32 %v1157_v13, %v1156_v12 }
 0x487   :  { %v1159_v19 = vrot.slane %v1158_v18, 1 }
 0x489   :  { %v1160_v20 = vadd.f32 %v1159_v19, %v1158_v18 }
 0x48b   :  { %v1163_v4 = vadd.f32 %v1162_v1, %v1160_v20 }
 0x48d   :  { %v1165_v3 = vand.u32 2147483647, %v1163_v4  ;;  %v1164_v29 = vmin.f32 %v1163_v4, 0.0 }
 0x48f   :  { %v1166_v6 = vsub.f32 0.0, %v1165_v3 }
 0x491   :  { %v1167_v8 = vmul.f32 1.442695, %v1166_v6 }
 0x493   :  { %1401 = vpow2.f32 %v1167_v8 }
 0x499   :  { %v1402_v11 = vpop.eup %1401 }
 0x49a   :  { %v1169_v14 = vadd.f32 1.0, %v1402_v11  ;;  %v1172_v22 = vmul.f32 -0.5, %v1402_v11  ;;  %v1175_v24 = vand.u32 2147483647, %v1402_v11 }
 0x49c   :  { %1403 = vlog2.f32 %v1169_v14  ;;  %v1173_v23 = vadd.f32 1.0, %v1172_v22  ;;  %vm1176_vm0 = vcmp.lt.f32.partialorder %v1175_v24, 0.0004427343 }
 0x49e   :  { %v1174_v27 = vmul.f32 %v1402_v11, %v1173_v23 }
 0x4a2   :  { %v1404_v25 = vpop.eup %1403 }
 0x4a3   :  { %v1171_v26 = vmul.f32 0.6931472, %v1404_v25 }
 0x4a5   :  { %v1177_v30 = vsel %vm1176_vm0, %v1174_v27, %v1171_v26 }
 0x4a6   :  { %v1178_v31 = vsub.f32 %v1164_v29, %v1177_v30 }
 0x4a8   :  { %1179 = vst [vmem:[#allocation3] sm:$0xff] %v1178_v31 }
 0x4a9   :  { %1190 = dma.vmem_to_hbm [thread:$0]  %s1186_s4, 128, %s1188_s10, [#allocation4]  }
 0x4aa   :  { %1429 = dma.done.wait [#allocation4], 128  }
 0x4ab   :  { %1430 = vsyncadd [#allocation4], 4294967168 }
 0x4ac   :  { %1195 = vsyncpa [#allocation4], 1 }

</bundles_post_ra>
